<compile_context>
chip_gen: v7x
topology: tpu7x:2x2x1
jax: 0.10.0
libtpu: 0.0.40
codegen_flags: <defaults>
</compile_context>

<pallas_src>
import jax
import jax.numpy as jnp
from jax.experimental import pallas as pl
from jax.experimental.pallas import tpu as pltpu


def _round_up(n, m):
    return ((n + m - 1) // m) * m


def _mlp_kernel(x_ref, w1_ref, b1_ref, w2_ref, b2_ref, o_ref):
    # Layer 1 on the MXU: cast the native-dtype x tile to bf16 in-register
    # (no extra HBM pass) against the resident bf16 W1; accumulate in f32.
    x_bf = x_ref[...].astype(jnp.bfloat16)
    h = jnp.dot(x_bf, w1_ref[...], preferred_element_type=jnp.float32)
    # Bias + ReLU in f32 on the VPU.
    h = jnp.maximum(h + b1_ref[...], 0.0)
    # TODO(synk): Dropout(0.1) is identity in eval mode (matches module.eval());
    # training-mode masking (pltpu.prng_seed + prng_random_bits, scale 1/0.9)
    # is intentionally not emitted here.
    # Layer 2 (out_features == 1): VPU multiply + cross-lane reduction with the
    # (1, H) w2 row -- no second MXU push/pop round trip.
    y = jnp.sum(h * w2_ref[...], axis=-1, keepdims=True)
    # TODO(synk): a lane-dense (tm//128, 128) output block would replace the
    # masked vst / narrow out-DMA of this (tm, 1) store, but requires a
    # sublane->lane relayout (reshape) whose Mosaic support is not guaranteed;
    # the store path is fully hidden under the f32 x-tile DMA that dominates
    # each grid step, so the narrow store is kept.
    o_ref[...] = (y + b2_ref[0]).astype(o_ref.dtype)


def _pick_tm(batch, cap=2048):
    """Rows per grid step: multiple of 16, >=2 grid steps once batch is large."""
    tm = _round_up(max(pl.cdiv(batch, 2), 16), 16)
    return int(min(cap, tm))


def patient_classifier_forward(x, w1, b1, w2, b2, *, tm=None):
    """Fused MLP forward.

    x : [B, D] float32 (or bfloat16).   w1: [D, H].   b1: [H] or [1, H].
    w2: [H, 1] / [1, H] / [H].          b2: any scalar-shaped array.
    Returns [B, 1] float32.  (bf16 MXU numerics on layer 1: inference contract.)
    """
    B, D = x.shape
    H = w1.shape[1]
    x_itemsize = jnp.dtype(x.dtype).itemsize

    # W1 is B-independent and tiny (768x256); a one-time wrapper cast to bf16
    # halves its kernel DMA / VMEM footprint.  x is NOT touched in the wrapper.
    w1_bf = w1.astype(jnp.bfloat16)
    b1_row = jnp.asarray(b1, jnp.float32).reshape(1, H)
    w2_row = jnp.asarray(w2, jnp.float32).reshape(1, H)
    b2_s = jnp.asarray(b2, jnp.float32).reshape(1)

    if tm is None:
        tm = _pick_tm(B)
    assert tm % 16 == 0, "tm must be a multiple of 16"

    grid = (pl.cdiv(B, tm),)   # ragged last block: OOB reads are garbage
                               # (per-row compute, discarded), OOB writes dropped.

    # Generation-aware VMEM ceiling (v7x has only 64 MiB per TensorCore).
    try:
        vmem_cap = int(pltpu.get_tpu_info().vmem_capacity_bytes)
    except Exception:
        vmem_cap = 64 << 20

    vmem_limit = (
        2 * tm * D * x_itemsize                 # x tiles (double-buffered)
        + 2 * D * H * 2                         # W1 bf16 (double-buffered)
        + 2 * 2 * 8 * _round_up(H, 128) * 4     # b1 / w2 rows (sublane-padded)
        + 2 * tm * 128 * 4                      # (tm, 1) f32 out, lane-padded
        + (8 << 20)                             # compiler scratch slack
    )
    vmem_limit = int(min(max(vmem_limit, 16 << 20), vmem_cap))

    cost = pl.CostEstimate(
        flops=2 * B * D * H + 4 * B * H,
        transcendentals=0,
        bytes_accessed=B * D * x_itemsize + D * H * 2 + 2 * H * 4 + 4 + B * 4,
    )

    out = pl.pallas_call(
        _mlp_kernel,
        out_shape=jax.ShapeDtypeStruct((B, 1), jnp.float32),
        grid_spec=pltpu.PrefetchScalarGridSpec(
            num_scalar_prefetch=0,
            grid=grid,
            in_specs=[
                pl.BlockSpec((tm, D), lambda i: (i, 0)),    # x tile (native dtype)
                pl.BlockSpec((D, H), lambda i: (0, 0)),     # W1 bf16 (resident)
                pl.BlockSpec((1, H), lambda i: (0, 0)),     # b1 row (f32)
                pl.BlockSpec((1, H), lambda i: (0, 0)),     # W2 row (f32)
                pl.BlockSpec(memory_space=pltpu.MemorySpace.SMEM),  # b2 scalar
            ],
            out_specs=pl.BlockSpec((tm, 1), lambda i: (i, 0)),
        ),
        compiler_params=pltpu.CompilerParams(
            dimension_semantics=("parallel",),
            vmem_limit_bytes=vmem_limit,
        ),
        cost_estimate=cost,
    )(x, w1_bf, b1_row, w2_row, b2_s)

    return out


def init_params(key, input_size=768, hidden_size=256):
    """Deterministic synthetic parameters (PyTorch-Linear-like uniform init)."""
    k1, k2, k3, k4 = jax.random.split(key, 4)
    bound1 = 1.0 / jnp.sqrt(input_size)
    bound2 = 1.0 / jnp.sqrt(hidden_size)
    # Stored transposed relative to PyTorch's [out, in] layout.
    w1 = jax.random.uniform(k1, (input_size, hidden_size), jnp.float32,
                            minval=-bound1, maxval=bound1)
    b1 = jax.random.uniform(k2, (1, hidden_size), jnp.float32,
                            minval=-bound1, maxval=bound1)
    w2 = jax.random.uniform(k3, (hidden_size, 1), jnp.float32,
                            minval=-bound2, maxval=bound2)
    b2 = jax.random.uniform(k4, (1, 1), jnp.float32,
                            minval=-bound2, maxval=bound2)
    return w1, b1, w2, b2


def _bf16_reference(x, w1, b1, w2, b2):
    """Same bf16 layer-1 operands as the kernel (f32 accumulation)."""
    h = jnp.maximum(
        jnp.dot(x.astype(jnp.bfloat16), w1.astype(jnp.bfloat16),
                preferred_element_type=jnp.float32) + b1.reshape(1, -1), 0.0)
    return h @ w2.reshape(-1, 1) + b2.reshape(1, 1)


if __name__ == "__main__":
    key = jax.random.PRNGKey(0)
    k_x, k_p, k_x2 = jax.random.split(key, 3)

    B, INPUT_SIZE, HIDDEN_SIZE = 8, 768, 256
    x = jax.random.normal(k_x, (B, INPUT_SIZE), jnp.float32)
    w1, b1, w2, b2 = init_params(k_p, INPUT_SIZE, HIDDEN_SIZE)

    out = patient_classifier_forward(x, w1, b1, w2, b2)
    out = jax.block_until_ready(out)
    assert out.shape == (B, 1)

    ref = _bf16_reference(x, w1, b1, w2, b2)
    assert jnp.allclose(out, ref, atol=1e-3, rtol=1e-3), \
        float(jnp.max(jnp.abs(out - ref)))

    # Loose sanity check against full-f32 PyTorch-equivalent math
    # (bf16 rounding of the layer-1 operands is the only difference).
    ref_f32 = (jnp.maximum(x @ w1 + b1.reshape(1, -1), 0.0)
               @ w2.reshape(-1, 1) + b2.reshape(1, 1))
    assert jnp.allclose(out, ref_f32, atol=5e-2, rtol=5e-2)

    # Exercise the ragged multi-step grid (B not a multiple of tm, grid > 1).
    B2 = 200
    x2 = jax.random.normal(k_x2, (B2, INPUT_SIZE), jnp.float32)
    out2 = jax.block_until_ready(patient_classifier_forward(x2, w1, b1, w2, b2))
    ref2 = _bf16_reference(x2, w1, b1, w2, b2)
    assert out2.shape == (B2, 1)
    assert jnp.allclose(out2, ref2, atol=1e-3, rtol=1e-3), \
        float(jnp.max(jnp.abs(out2 - ref2)))

    print("KERNEL_OK")
</pallas_src>

<mosaic_0001>
module attributes {stable_mosaic.version = 11 : i64} {
  func.func @_mlp_kernel(%arg0: i32, %arg1: memref<16x768xf32, #tpu.memory_space<vmem>>, %arg2: memref<768x256xbf16, #tpu.memory_space<vmem>>, %arg3: memref<1x256xf32, #tpu.memory_space<vmem>>, %arg4: memref<1x256xf32, #tpu.memory_space<vmem>>, %arg5: memref<1xf32, #tpu.memory_space<smem>>, %arg6: memref<16x1xf32, #tpu.memory_space<vmem>>) attributes {dimension_semantics = [#tpu.dimension_semantics<parallel>], iteration_bounds = array<i64: 1>, scalar_prefetch = 0 : i64, scratch_operands = 0 : i64, tpu.core_type = #tpu.core_type<tc>, window_params = [{transform_indices = @transform_0, window_bounds = array<i64: 16, 768>}, {pipeline_mode = #tpu.pipeline_mode<synchronous>, transform_indices = @transform_1, window_bounds = array<i64: 768, 256>}, {pipeline_mode = #tpu.pipeline_mode<synchronous>, transform_indices = @transform_2, window_bounds = array<i64: 1, 256>}, {pipeline_mode = #tpu.pipeline_mode<synchronous>, transform_indices = @transform_3, window_bounds = array<i64: 1, 256>}, {transform_indices = @transform_4, window_bounds = array<i64: 1>}, {transform_indices = @transform_5, window_bounds = array<i64: 16, 1>}]} {
    %c0 = arith.constant 0 : index
    %c0_0 = arith.constant 0 : index
    %0 = vector.load %arg1[%c0, %c0_0] : memref<16x768xf32, #tpu.memory_space<vmem>>, vector<16x768xf32>
    %1 = arith.truncf %0 : vector<16x768xf32> to vector<16x768xbf16>
    %c0_1 = arith.constant 0 : index
    %c0_2 = arith.constant 0 : index
    %2 = vector.load %arg2[%c0_1, %c0_2] : memref<768x256xbf16, #tpu.memory_space<vmem>>, vector<768x256xbf16>
    %cst = arith.constant dense<0.000000e+00> : vector<16x256xf32>
    %3 = tpu.matmul %1, %2, %cst {dimension_numbers = #tpu.dot_dimension_numbers<[1], [0], [0], [1], [0, 0, 1, 1], [], []>} : vector<16x768xbf16>, vector<768x256xbf16>, vector<16x256xf32> -> vector<16x256xf32>
    %c0_3 = arith.constant 0 : index
    %c0_4 = arith.constant 0 : index
    %4 = vector.load %arg3[%c0_3, %c0_4] : memref<1x256xf32, #tpu.memory_space<vmem>>, vector<1x256xf32>
    %5 = vector.broadcast %4 : vector<1x256xf32> to vector<16x256xf32>
    %6 = arith.addf %3, %5 : vector<16x256xf32>
    %cst_5 = arith.constant 0.000000e+00 : f32
    %7 = vector.broadcast %cst_5 : f32 to vector<16x256xf32>
    %8 = arith.maximumf %6, %7 : vector<16x256xf32>
    %c0_6 = arith.constant 0 : index
    %c0_7 = arith.constant 0 : index
    %9 = vector.load %arg4[%c0_6, %c0_7] : memref<1x256xf32, #tpu.memory_space<vmem>>, vector<1x256xf32>
    %10 = vector.broadcast %9 : vector<1x256xf32> to vector<16x256xf32>
    %11 = arith.mulf %8, %10 : vector<16x256xf32>
    %cst_8 = arith.constant dense<0.000000e+00> : vector<16xf32>
    %12 = vector.multi_reduction <add>, %11, %cst_8 [1] : vector<16x256xf32> to vector<16xf32>
    %13 = vector.shape_cast %12 : vector<16xf32> to vector<16x1xf32>
    %c0_9 = arith.constant 0 : index
    %14 = memref.load %arg5[%c0_9] : memref<1xf32, #tpu.memory_space<smem>>
    %15 = vector.broadcast %14 : f32 to vector<16x1xf32>
    %16 = arith.addf %13, %15 : vector<16x1xf32>
    %c0_10 = arith.constant 0 : index
    %c0_11 = arith.constant 0 : index
    %17 = vector.load %arg6[%c0_10, %c0_11] : memref<16x1xf32, #tpu.memory_space<vmem>>, vector<16x1xf32>
    tpu.vector_store %arg6[%c0_10, %c0_11], %16 {strides = array<i32>} : memref<16x1xf32, #tpu.memory_space<vmem>>, vector<16x1xf32>,
    return
  }
  func.func @transform_0(%arg0: i32) -> (i32, i32) {
    %c0_i32 = arith.constant 0 : i32
    %c0_i32_0 = arith.constant 0 : i32
    return %arg0, %c0_i32 : i32, i32
  }
  func.func @transform_1(%arg0: i32) -> (i32, i32) {
    %c0_i32 = arith.constant 0 : i32
    %c0_i32_0 = arith.constant 0 : i32
    %c0_i32_1 = arith.constant 0 : i32
    return %c0_i32, %c0_i32_0 : i32, i32
  }
  func.func @transform_2(%arg0: i32) -> (i32, i32) {
    %c0_i32 = arith.constant 0 : i32
    %c0_i32_0 = arith.constant 0 : i32
    %c0_i32_1 = arith.constant 0 : i32
    return %c0_i32, %c0_i32_0 : i32, i32
  }
  func.func @transform_3(%arg0: i32) -> (i32, i32) {
    %c0_i32 = arith.constant 0 : i32
    %c0_i32_0 = arith.constant 0 : i32
    %c0_i32_1 = arith.constant 0 : i32
    return %c0_i32, %c0_i32_0 : i32, i32
  }
  func.func @transform_4(%arg0: i32) -> i32 {
    %c0_i32 = arith.constant 0 : i32
    %c0_i32_0 = arith.constant 0 : i32
    return %c0_i32 : i32
  }
  func.func @transform_5(%arg0: i32) -> (i32, i32) {
    %c0_i32 = arith.constant 0 : i32
    %c0_i32_0 = arith.constant 0 : i32
    return %arg0, %c0_i32 : i32, i32
  }
}

</mosaic_0001>

<bundles_post_ra>
// kernel: tpu_custom_call.1
= control target key start
LH: loop header
LB: loop body
LE: loop exit
PB: predicated region body
PF: predicated region fallthrough
CT: control target
= control target key end

     0   :  { %11 = vsyncpa [#allocation4], 0  ;;  %s1237_s0 = inlined_call_operand.hbm [shape: f32[8,768], index: 0, kind: input, shape index: {}]   ;;  %s1238_s1 = inlined_call_operand.hbm [shape: bf16[768,256], index: 1, kind: input, shape index: {}]   ;;  %s1239_s2 = inlined_call_operand.vmem [shape: f32[1,256], index: 2, kind: input, shape index: {}]   ;;  %s1240_s3 = inlined_call_operand.vmem [shape: f32[1,256], index: 3, kind: input, shape index: {}]   ;;  %s1241_s4 = inlined_call_operand.<no memory space> [shape: f32[1], index: 4, kind: input, shape index: {}]   ;;  %s1242_s5 = inlined_call_operand.vmem [shape: f32[8,1], index: 5, kind: output, shape index: {}]  }
   0x1   :  { %12 = vsyncpa [#allocation6], 0 }
   0x2   :  { %17 = vsyncadd [#allocation4], 768  ;;  %s1165_s18 = smov [#allocation3]   ;;  %s1117_s22 = scalar_lea.hbm %s1237_s0, 768 }
   0x3   :  { %s18_s19 = sshll.u32 %s1165_s18, 4  ;;  %p1118_p0 = scmp.ne.s32.totalorder %s1237_s0, %s1117_s22  ;;  %s19_s19 = int_to_ptr.vmem [resolvable:$true] %s18_s19 }
   0x4   :  { %p1121_p1 = scmp.lt.u32.totalorder %s1117_s22, %s1237_s0 }
   0x6   :  { %p1123_p2 = pnand %p1121_p1, %p1118_p0 }
   0x8   :  { %1126 = shalt.err (!%p1123_p2)
}
   0x9   :  { %s1127_s27 = scalar_lea.vmem %s19_s19, 768  ;;  %s1131_s28 = scalar_lea.vmem %s19_s19, 1536 }
   0xa   :  { %p1128_p3 = scmp.ne.s32.totalorder %s19_s19, %s1127_s27  ;;  %p1132_p4 = scmp.lt.s32.totalorder %s19_s19, %s19_s19 }
   0xb   :  { %p1133_p5 = scmp.lt.s32.totalorder %s1131_s28, %s1127_s27 }
   0xd   :  { %p1134_p6 = por %p1133_p5, %p1132_p4 }
   0xf   :  { %p1135_p7 = pnand %p1134_p6, %p1128_p3 }
  0x11   :  { %1138 = shalt.err (!%p1135_p7)
}
  0x12   :  { %s1166_s29 = smov 768   ;;  %s1167_s30 = smov 48  }
  0x13   :  { %24 = dma.hbm_to_vmem [thread:$0]  %s1237_s0, 768, %s19_s19, [#allocation4], %s1166_s29, %s1166_s29, %s1167_s30  }
  0x14   :  { %s1168_s8 = smov [#allocation5]   ;;  %s1139_s12 = scalar_lea.hbm %s1238_s1, 12288 }
  0x15   :  { %s30_s9 = sshll.u32 %s1168_s8, 4  ;;  %p1140_p8 = scmp.ne.s32.totalorder %s1238_s1, %s1139_s12  ;;  %s31_s9 = int_to_ptr.vmem [resolvable:$true] %s30_s9 }
  0x16   :  { %p1143_p9 = scmp.lt.u32.totalorder %s1139_s12, %s1238_s1 }
  0x18   :  { %p1145_p10 = pnand %p1143_p9, %p1140_p8 }
  0x1a   :  { %1148 = shalt.err (!%p1145_p10)
}
  0x1b   :  { %s1149_s17 = scalar_lea.vmem %s31_s9, 12288  ;;  %p1154_p12 = scmp.lt.s32.totalorder %s31_s9, %s31_s9 }
  0x1c   :  { %p1150_p11 = scmp.ne.s32.totalorder %s31_s9, %s1149_s17  ;;  %p1155_p13 = scmp.lt.s32.totalorder %s1149_s17, %s1149_s17 }
  0x1e   :  { %p1156_p0 = por %p1155_p13, %p1154_p12 }
  0x20   :  { %p1157_p1 = pnand %p1156_p0, %p1150_p11 }
  0x22   :  { %1160 = shalt.err (!%p1157_p1)
}
  0x23   :  { %s1169_s0 = smov 128   ;;  %s1170_s18 = smov 8  }
  0x24   :  { %36 = dma.hbm_to_vmem [thread:$0]  %s1238_s1, 12288, %s31_s9, [#allocation6], %s1169_s0, %s1169_s0, %s1170_s18  }
  0x25   :  { %1161 = dma.done.wait [#allocation4], 1536  }
  0x26   :  { %1162 = vsyncadd [#allocation4], 4294965760 }
  0x27   :  { %1163 = dma.done.wait [#allocation6], 12288  }
  0x28   :  { %1164 = vsyncadd [#allocation6], 4294955008  ;;  %v973_v0 = vld [vmem:[#allocation5 + $0x104] ss:$8 sps:$4 sm:$0xff]   ;;  %v975_v1 = vld [vmem:[#allocation5 + $0x100] ss:$8 sps:$4 sm:$0xff]  }
  0x29   :  { %698 = vmatprep.subr.bf16.mxu0 %v973_v0  ;;  %v976_v2 = vld [vmem:[#allocation5 + $0x114] ss:$8 sps:$4 sm:$0xff]   ;;  %v978_v3 = vld [vmem:[#allocation5 + $0x110] ss:$8 sps:$4 sm:$0xff]   ;;  %v979_v4 = vld [vmem:[#allocation5 + $0x124] ss:$8 sps:$4 sm:$0xff]  }
  0x2a   :  { %699 = vmatpush1.bf16.msra.mxu0 %v975_v1  ;;  %v981_v5 = vld [vmem:[#allocation5 + $0x120] ss:$8 sps:$4 sm:$0xff]   ;;  %v982_v6 = vld [vmem:[#allocation5 + $0x134] ss:$8 sps:$4 sm:$0xff]   ;;  %v984_v7 = vld [vmem:[#allocation5 + $0x130] ss:$8 sps:$4 sm:$0xff]  }
  0x2b   :  { %700 = vmatprep.subr.bf16.mxu0 %v976_v2  ;;  %v985_v8 = vld [vmem:[#allocation5 + $0x144] ss:$8 sps:$4 sm:$0xff]   ;;  %v987_v9 = vld [vmem:[#allocation5 + $0x140] ss:$8 sps:$4 sm:$0xff]   ;;  %v988_v10 = vld [vmem:[#allocation5 + $0x154] ss:$8 sps:$4 sm:$0xff]  }
  0x2c   :  { %v990_v11 = vld [vmem:[#allocation5 + $0x150] ss:$8 sps:$4 sm:$0xff]   ;;  %v991_v12 = vld [vmem:[#allocation5 + $0x164] ss:$8 sps:$4 sm:$0xff]   ;;  %v1020_v14 = vld [vmem:[#allocation5] ss:$8 sps:$4 sm:$0xff]  }
  0x2d   :  { %v1018_v13 = vld [vmem:[#allocation5 + $0x4] ss:$8 sps:$4 sm:$0xff]   ;;  %v993_v15 = vld [vmem:[#allocation5 + $0x160] ss:$8 sps:$4 sm:$0xff]   ;;  %v994_v16 = vld [vmem:[#allocation5 + $0x174] ss:$8 sps:$4 sm:$0xff]  }
  0x2e   :  { %701 = vmatpush1.bf16.msra.mxu0 %v978_v3  ;;  %655 = vmatprep.subr.bf16.mxu1 %v1018_v13  ;;  %v1024_v17 = vld [vmem:[#allocation5 + $0x14] ss:$8 sps:$4 sm:$0xff]   ;;  %v1026_v18 = vld [vmem:[#allocation5 + $0x10] ss:$8 sps:$4 sm:$0xff]   ;;  %v58_v20 = vld [vmem:[#allocation3 + $0x48] sm:$0xff]  ;;  %vm814_vm0 = vcmask 7168  }
  0x2f   :  { %702 = vmatprep.subr.bf16.mxu0 %v979_v4  ;;  %656 = vmatpush1.bf16.msra.mxu1 %v1020_v14  ;;  %v52_v19 = vld [vmem:[#allocation3 + $0x18] sm:$0xff]  ;;  %v1030_v23 = vld [vmem:[#allocation5 + $0x24] ss:$8 sps:$4 sm:$0xff]   ;;  %v1032_v24 = vld [vmem:[#allocation5 + $0x20] ss:$8 sps:$4 sm:$0xff]  }
  0x30   :  { %657 = vmatprep.subr.bf16.mxu1 %v1024_v17  ;;  %v64_v21 = vpack.c.bf16 %v58_v20, %v52_v19  ;;  %v996_v22 = vld [vmem:[#allocation5 + $0x170] ss:$8 sps:$4 sm:$0xff]   ;;  %v997_v25 = vld [vmem:[#allocation5 + $0x184] ss:$8 sps:$4 sm:$0xff]   ;;  %v999_v26 = vld [vmem:[#allocation5 + $0x180] ss:$8 sps:$4 sm:$0xff]  }
  0x31   :  { %v1036_v27 = vld [vmem:[#allocation5 + $0x34] ss:$8 sps:$4 sm:$0xff]   ;;  %v1038_v29 = vld [vmem:[#allocation5 + $0x30] ss:$8 sps:$4 sm:$0xff]   ;;  %v1042_v30 = vld [vmem:[#allocation5 + $0x44] ss:$8 sps:$4 sm:$0xff]  }
  0x32   :  { %703 = vmatpush1.bf16.msra.mxu0 %v981_v5  ;;  %730 = vmatprep.mubr.bf16.mxu0 %v64_v21  ;;  %v1000_v28 = vld [vmem:[#allocation5 + $0x194] ss:$8 sps:$4 sm:$0xff]   ;;  %v1002_v31 = vld [vmem:[#allocation5 + $0x190] ss:$8 sps:$4 sm:$0xff]   ;;  %v1003_v32 = vld [vmem:[#allocation5 + $0x1a4] ss:$8 sps:$4 sm:$0xff]  }
  0x33   :  { %704 = vmatprep.subr.bf16.mxu0 %v982_v6  ;;  %658 = vmatpush1.bf16.msra.mxu1 %v1026_v18  ;;  %v1044_v33 = vld [vmem:[#allocation5 + $0x40] ss:$8 sps:$4 sm:$0xff]   ;;  %v1048_v34 = vld [vmem:[#allocation5 + $0x54] ss:$8 sps:$4 sm:$0xff]   ;;  %v1050_v37 = vld [vmem:[#allocation5 + $0x50] ss:$8 sps:$4 sm:$0xff]  }
  0x34   :  { %659 = vmatprep.subr.bf16.mxu1 %v1030_v23  ;;  %v1005_v35 = vld [vmem:[#allocation5 + $0x1a0] ss:$8 sps:$4 sm:$0xff]   ;;  %v1006_v36 = vld [vmem:[#allocation5 + $0x1b4] ss:$8 sps:$4 sm:$0xff]   ;;  %v1054_v38 = vld [vmem:[#allocation5 + $0x64] ss:$8 sps:$4 sm:$0xff]  }
  0x35   :  { %v1008_v39 = vld [vmem:[#allocation5 + $0x1b0] ss:$8 sps:$4 sm:$0xff]   ;;  %v1009_v40 = vld [vmem:[#allocation5 + $0x1c4] ss:$8 sps:$4 sm:$0xff]   ;;  %v1056_v41 = vld [vmem:[#allocation5 + $0x60] ss:$8 sps:$4 sm:$0xff]  }
  0x36   :  { %705 = vmatpush1.bf16.msra.mxu0 %v984_v7  ;;  %v1060_v42 = vld [vmem:[#allocation5 + $0x74] ss:$8 sps:$4 sm:$0xff]   ;;  %v1011_v43 = vld [vmem:[#allocation5 + $0x1c0] ss:$8 sps:$4 sm:$0xff]   ;;  %v1062_v45 = vld [vmem:[#allocation5 + $0x70] ss:$8 sps:$4 sm:$0xff]  }
  0x37   :  { %706 = vmatprep.subr.bf16.mxu0 %v985_v8  ;;  %660 = vmatpush1.bf16.msra.mxu1 %v1032_v24  ;;  %v1012_v44 = vld [vmem:[#allocation5 + $0x1d4] ss:$8 sps:$4 sm:$0xff]   ;;  %v1066_v46 = vld [vmem:[#allocation5 + $0x84] ss:$8 sps:$4 sm:$0xff]   ;;  %v1014_v47 = vld [vmem:[#allocation5 + $0x1d0] ss:$8 sps:$4 sm:$0xff]  }
  0x38   :  { %661 = vmatprep.subr.bf16.mxu1 %v1036_v27  ;;  %v1015_v48 = vld [vmem:[#allocation5 + $0x1e4] ss:$8 sps:$4 sm:$0xff]   ;;  %v1068_v49 = vld [vmem:[#allocation5 + $0x80] ss:$8 sps:$4 sm:$0xff]   ;;  %v1072_v50 = vld [vmem:[#allocation5 + $0x94] ss:$8 sps:$4 sm:$0xff]  }
  0x39   :  { %v1017_v51 = vld [vmem:[#allocation5 + $0x1e0] ss:$8 sps:$4 sm:$0xff]   ;;  %v1021_v52 = vld [vmem:[#allocation5 + $0x1f4] ss:$8 sps:$4 sm:$0xff]   ;;  %v1074_v53 = vld [vmem:[#allocation5 + $0x90] ss:$8 sps:$4 sm:$0xff]  }
  0x3a   :  { %707 = vmatpush1.bf16.msra.mxu0 %v987_v9  ;;  %v1078_v54 = vld [vmem:[#allocation5 + $0xa4] ss:$8 sps:$4 sm:$0xff]   ;;  %v1023_v55 = vld [vmem:[#allocation5 + $0x1f0] ss:$8 sps:$4 sm:$0xff]   ;;  %v1080_v59 = vld [vmem:[#allocation5 + $0xa0] ss:$8 sps:$4 sm:$0xff]  }
  0x3b   :  { %708 = vmatprep.subr.bf16.mxu0 %v988_v10  ;;  %662 = vmatpush1.bf16.msra.mxu1 %v1038_v29  ;;  %v1029_v56 = vld [vmem:[#allocation5 + $0x204] ss:$8 sps:$4 sm:$0xff]   ;;  %v51_v57 = vld [vmem:[#allocation3 + $0x10] sm:$0xff]  ;;  %v1027_v61 = vld [vmem:[#allocation5 + $0x200] ss:$8 sps:$4 sm:$0xff]  }
  0x3c   :  { %663 = vmatprep.subr.bf16.mxu1 %v1042_v30  ;;  %v57_v58 = vld [vmem:[#allocation3 + $0x40] sm:$0xff]  ;;  %v1084_v60 = vld [vmem:[#allocation5 + $0xb4] ss:$8 sps:$4 sm:$0xff]   ;;  %v1086_v0 = vld [vmem:[#allocation5 + $0xb0] ss:$8 sps:$4 sm:$0xff]  }
  0x3d   :  { %v63_v62 = vpack.c.bf16 %v57_v58, %v51_v57  ;;  %v1035_v63 = vld [vmem:[#allocation5 + $0x214] ss:$8 sps:$4 sm:$0xff]   ;;  %v1090_v1 = vld [vmem:[#allocation5 + $0xc4] ss:$8 sps:$4 sm:$0xff]   ;;  %v1033_v6 = vld [vmem:[#allocation5 + $0x210] ss:$8 sps:$4 sm:$0xff]  }
  0x3e   :  { %709 = vmatpush1.bf16.msra.mxu0 %v990_v11  ;;  %v50_v2 = vld [vmem:[#allocation3 + $0x8] sm:$0xff]  ;;  %v56_v3 = vld [vmem:[#allocation3 + $0x38] sm:$0xff]  ;;  %v55_v23 = vld [vmem:[#allocation3 + $0x30] sm:$0xff] }
  0x3f   :  { %710 = vmatprep.subr.bf16.mxu0 %v991_v12  ;;  %664 = vmatpush1.bf16.msra.mxu1 %v1044_v33  ;;  %v62_v4 = vpack.c.bf16 %v56_v3, %v50_v2  ;;  %v54_v5 = vld [vmem:[#allocation3 + $0x28] sm:$0xff]  ;;  %v60_v8 = vld [vmem:[#allocation3 + $0x58] sm:$0xff]  ;;  %v163_v57 = vld [vmem:[%s1239_s2] sm:$0x3] }
  0x40   :  { %665 = vmatprep.subr.bf16.mxu1 %v1048_v34  ;;  %v1092_v7 = vld [vmem:[#allocation5 + $0xc0] ss:$8 sps:$4 sm:$0xff]   ;;  %v1041_v9 = vld [vmem:[#allocation5 + $0x224] ss:$8 sps:$4 sm:$0xff]   ;;  %v1096_v10 = vld [vmem:[#allocation5 + $0xd4] ss:$8 sps:$4 sm:$0xff]   ;;  %v66_v11 = vpack.c.bf16 %v60_v8, %v54_v5 }
  0x41   :  { %687 = vmatprep.mubr.bf16.mxu1 %v62_v4  ;;  %v1039_v12 = vld [vmem:[#allocation5 + $0x220] ss:$8 sps:$4 sm:$0xff]   ;;  %v1098_v13 = vld [vmem:[#allocation5 + $0xd0] ss:$8 sps:$4 sm:$0xff]   ;;  %v1047_v14 = vld [vmem:[#allocation5 + $0x234] ss:$8 sps:$4 sm:$0xff]  }
  0x42   :  { %711 = vmatpush1.bf16.msra.mxu0 %v993_v15  ;;  %v1102_v15 = vld [vmem:[#allocation5 + $0xe4] ss:$8 sps:$4 sm:$0xff]   ;;  %v1104_v17 = vld [vmem:[#allocation5 + $0xe0] ss:$8 sps:$4 sm:$0xff]   ;;  %v1108_v19 = vld [vmem:[#allocation5 + $0xf4] ss:$8 sps:$4 sm:$0xff]  }
  0x43   :  { %712 = vmatprep.subr.bf16.mxu0 %v994_v16  ;;  %666 = vmatpush1.bf16.msra.mxu1 %v1050_v37  ;;  %v1045_v16 = vld [vmem:[#allocation5 + $0x230] ss:$8 sps:$4 sm:$0xff]   ;;  %v1053_v18 = vld [vmem:[#allocation5 + $0x244] ss:$8 sps:$4 sm:$0xff]   ;;  %v1051_v20 = vld [vmem:[#allocation5 + $0x240] ss:$8 sps:$4 sm:$0xff]  }
  0x44   :  { %667 = vmatprep.subr.bf16.mxu1 %v1054_v38  ;;  %v1110_v21 = vld [vmem:[#allocation5 + $0xf0] ss:$8 sps:$4 sm:$0xff]   ;;  %v1059_v24 = vld [vmem:[#allocation5 + $0x254] ss:$8 sps:$4 sm:$0xff]   ;;  %v1065_v27 = vld [vmem:[#allocation5 + $0x264] ss:$8 sps:$4 sm:$0xff]  }
  0x45   :  { %v1071_v29 = vld [vmem:[#allocation5 + $0x274] ss:$8 sps:$4 sm:$0xff]   ;;  %v1069_v30 = vld [vmem:[#allocation5 + $0x270] ss:$8 sps:$4 sm:$0xff]  }
  0x46   :  { %713 = vmatpush1.bf16.msra.mxu0 %v996_v22  ;;  %v49_v22 = vld [vmem:[#allocation3] sm:$0xff]  ;;  %v1083_v33 = vld [vmem:[#allocation5 + $0x294] ss:$8 sps:$4 sm:$0xff]   ;;  %v1081_v34 = vld [vmem:[#allocation5 + $0x290] ss:$8 sps:$4 sm:$0xff]  }
  0x47   :  { %714 = vmatprep.subr.bf16.mxu0 %v997_v25  ;;  %668 = vmatpush1.bf16.msra.mxu1 %v1056_v41  ;;  %v61_v25 = vpack.c.bf16 %v55_v23, %v49_v22  ;;  %v1095_v37 = vld [vmem:[#allocation5 + $0x2b4] ss:$8 sps:$4 sm:$0xff]   ;;  %v1093_v38 = vld [vmem:[#allocation5 + $0x2b0] ss:$8 sps:$4 sm:$0xff]   ;;  %v811_v22 = vstv %s1241_s4 }
  0x48   :  { %669 = vmatprep.subr.bf16.mxu1 %v1060_v42  ;;  %v1107_v41 = vld [vmem:[#allocation5 + $0x2d4] ss:$8 sps:$4 sm:$0xff]   ;;  %v1105_v42 = vld [vmem:[#allocation5 + $0x2d0] ss:$8 sps:$4 sm:$0xff]  }
  0x4a   :  { %715 = vmatpush1.bf16.msra.mxu0 %v999_v26  ;;  %v1057_v26 = vld [vmem:[#allocation5 + $0x250] ss:$8 sps:$4 sm:$0xff]  }
  0x4b   :  { %716 = vmatprep.subr.bf16.mxu0 %v1000_v28  ;;  %670 = vmatpush1.bf16.msra.mxu1 %v1062_v45  ;;  %v1063_v28 = vld [vmem:[#allocation5 + $0x260] ss:$8 sps:$4 sm:$0xff]   ;;  %v1116_v45 = vld [vmem:[#allocation5 + $0x2f4] ss:$8 sps:$4 sm:$0xff]  }
  0x4c   :  { %671 = vmatprep.subr.bf16.mxu1 %v1066_v46  ;;  %v1114_v46 = vld [vmem:[#allocation5 + $0x2f0] ss:$8 sps:$4 sm:$0xff]  }
  0x4e   :  { %717 = vmatpush1.bf16.msra.mxu0 %v1002_v31  ;;  %v1077_v31 = vld [vmem:[#allocation5 + $0x284] ss:$8 sps:$4 sm:$0xff]  }
  0x4f   :  { %718 = vmatprep.subr.bf16.mxu0 %v1003_v32  ;;  %672 = vmatpush1.bf16.msra.mxu1 %v1068_v49  ;;  %v1075_v32 = vld [vmem:[#allocation5 + $0x280] ss:$8 sps:$4 sm:$0xff]  }
  0x50   :  { %673 = vmatprep.subr.bf16.mxu1 %v1072_v50 }
  0x52   :  { %719 = vmatpush1.bf16.msra.mxu0 %v1005_v35  ;;  %v1089_v35 = vld [vmem:[#allocation5 + $0x2a4] ss:$8 sps:$4 sm:$0xff]  }
  0x53   :  { %720 = vmatprep.subr.bf16.mxu0 %v1006_v36  ;;  %674 = vmatpush1.bf16.msra.mxu1 %v1074_v53  ;;  %v1087_v36 = vld [vmem:[#allocation5 + $0x2a0] ss:$8 sps:$4 sm:$0xff]  }
  0x54   :  { %675 = vmatprep.subr.bf16.mxu1 %v1078_v54  ;;  %v165_v54 = vlaneseq }
  0x56   :  { %721 = vmatpush1.bf16.msra.mxu0 %v1008_v39  ;;  %v1101_v39 = vld [vmem:[#allocation5 + $0x2c4] ss:$8 sps:$4 sm:$0xff]  }
  0x57   :  { %722 = vmatprep.subr.bf16.mxu0 %v1009_v40  ;;  %676 = vmatpush1.bf16.msra.mxu1 %v1080_v59  ;;  %v1099_v40 = vld [vmem:[#allocation5 + $0x2c0] ss:$8 sps:$4 sm:$0xff]  }
  0x58   :  { %677 = vmatprep.subr.bf16.mxu1 %v1084_v60 }
  0x5a   :  { %723 = vmatpush1.bf16.msra.mxu0 %v1011_v43  ;;  %v1113_v43 = vld [vmem:[#allocation5 + $0x2e4] ss:$8 sps:$4 sm:$0xff]  }
  0x5b   :  { %724 = vmatprep.subr.bf16.mxu0 %v1012_v44  ;;  %678 = vmatpush1.bf16.msra.mxu1 %v1086_v0  ;;  %v1111_v44 = vld [vmem:[#allocation5 + $0x2e0] ss:$8 sps:$4 sm:$0xff]  }
  0x5c   :  { %679 = vmatprep.subr.bf16.mxu1 %v1090_v1 }
  0x5e   :  { %725 = vmatpush1.bf16.msra.mxu0 %v1014_v47  ;;  %v53_v47 = vld [vmem:[#allocation3 + $0x20] sm:$0xff] }
  0x5f   :  { %726 = vmatprep.subr.bf16.mxu0 %v1015_v48  ;;  %680 = vmatpush1.bf16.msra.mxu1 %v1092_v7  ;;  %v59_v48 = vld [vmem:[#allocation3 + $0x50] sm:$0xff] }
  0x60   :  { %681 = vmatprep.subr.bf16.mxu1 %v1096_v10  ;;  %v65_v49 = vpack.c.bf16 %v59_v48, %v53_v47 }
  0x62   :  { %727 = vmatpush1.bf16.msra.mxu0 %v1017_v51 }
  0x63   :  { %728 = vmatprep.subr.bf16.mxu0 %v1021_v52  ;;  %682 = vmatpush1.bf16.msra.mxu1 %v1098_v13 }
  0x64   :  { %683 = vmatprep.subr.bf16.mxu1 %v1102_v15 }
  0x66   :  { %729 = vmatpush1.bf16.msra.mxu0 %v1023_v55  ;;  %v166_v55 = vshrl.u32 %v165_v54, 7 }
  0x67   :  { %741 = vmatprep.subr.bf16.mxu0 %v1029_v56  ;;  %684 = vmatpush1.bf16.msra.mxu1 %v1104_v17 }
  0x68   :  { %685 = vmatprep.subr.bf16.mxu1 %v1108_v19  ;;  %v167_v56 = vsub.s32 0, %v166_v55  ;;  %v171_v58 = vsub.s32 1, %v166_v55 }
  0x69   :  { %731 = vmatmul.mubr.bf16.vlgmr.msra.gmra.mrb[0].mxu0 %v63_v62 }
  0x6a   :  { %742 = vmatpush1.bf16.msra.mxu0 %v1027_v61  ;;  %773 = vmatprep.mubr.bf16.mxu0 %v66_v11  ;;  %v168_v59 = vrot.slane %v163_v57, %v167_v56  ;;  %v172_v60 = vrot.slane %v163_v57, %v171_v58 }
  0x6b   :  { %743 = vmatprep.subr.bf16.mxu0 %v1035_v63  ;;  %686 = vmatpush1.bf16.msra.mxu1 %v1110_v21  ;;  %v788_v63 = vld [vmem:[%s1240_s3] sm:$0x3] }
  0x6c   :  { %v793_v4 = vrot.slane %v788_v63, %v167_v56  ;;  %v797_v8 = vrot.slane %v788_v63, %v171_v58 }
  0x6e   :  { %744 = vmatpush1.bf16.msra.mxu0 %v1033_v6  ;;  %688 = vmatmul.mubr.bf16.vlgmr.msra.gmra.mrb[0].mxu1 %v61_v25 }
  0x6f   :  { %745 = vmatprep.subr.bf16.mxu0 %v1041_v9 }
  0x72   :  { %746 = vmatpush1.bf16.msra.mxu0 %v1039_v12 }
  0x73   :  { %747 = vmatprep.subr.bf16.mxu0 %v1047_v14 }
  0x76   :  { %748 = vmatpush1.bf16.msra.mxu0 %v1045_v16 }
  0x77   :  { %749 = vmatprep.subr.bf16.mxu0 %v1053_v18 }
  0x7a   :  { %750 = vmatpush1.bf16.msra.mxu0 %v1051_v20 }
  0x7b   :  { %751 = vmatprep.subr.bf16.mxu0 %v1059_v24 }
  0x7e   :  { %752 = vmatpush1.bf16.msra.mxu0 %v1057_v26 }
  0x7f   :  { %753 = vmatprep.subr.bf16.mxu0 %v1065_v27 }
  0x82   :  { %754 = vmatpush1.bf16.msra.mxu0 %v1063_v28 }
  0x83   :  { %755 = vmatprep.subr.bf16.mxu0 %v1071_v29 }
  0x86   :  { %756 = vmatpush1.bf16.msra.mxu0 %v1069_v30 }
  0x87   :  { %757 = vmatprep.subr.bf16.mxu0 %v1077_v31 }
  0x8a   :  { %758 = vmatpush1.bf16.msra.mxu0 %v1075_v32 }
  0x8b   :  { %759 = vmatprep.subr.bf16.mxu0 %v1083_v33 }
  0x8e   :  { %760 = vmatpush1.bf16.msra.mxu0 %v1081_v34 }
  0x8f   :  { %761 = vmatprep.subr.bf16.mxu0 %v1089_v35 }
  0x92   :  { %762 = vmatpush1.bf16.msra.mxu0 %v1087_v36 }
  0x93   :  { %763 = vmatprep.subr.bf16.mxu0 %v1095_v37 }
  0x96   :  { %764 = vmatpush1.bf16.msra.mxu0 %v1093_v38 }
  0x97   :  { %765 = vmatprep.subr.bf16.mxu0 %v1101_v39 }
  0x9a   :  { %766 = vmatpush1.bf16.msra.mxu0 %v1099_v40 }
  0x9b   :  { %767 = vmatprep.subr.bf16.mxu0 %v1107_v41 }
  0x9e   :  { %768 = vmatpush1.bf16.msra.mxu0 %v1105_v42 }
  0x9f   :  { %769 = vmatprep.subr.bf16.mxu0 %v1113_v43 }
  0xa2   :  { %770 = vmatpush1.bf16.msra.mxu0 %v1111_v44 }
  0xa3   :  { %771 = vmatprep.subr.bf16.mxu0 %v1116_v45 }
  0xa6   :  { %772 = vmatpush1.bf16.msra.mxu0 %v1114_v46 }
  0xa9   :  { %774 = vmatmul.mubr.bf16.vlgmr.msra.gmra.mrb[0].mxu0 %v65_v49 }
 0x141   :  { %v689_v50 = vpop.f32.mrb[0].mxu1 }
 0x142   :  { %v691_v51 = vpop.f32.mrb[1].mxu1  ;;  %v690_v61 = vadd.f32 %v689_v50, %v168_v59 }
 0x143   :  { %v693_v52 = vpop.f32.mrb[2].mxu1  ;;  %v692_v62 = vadd.f32 %v691_v51, %v172_v60 }
 0x144   :  { %v695_v53 = vpop.f32.mrb[3].mxu1  ;;  %v694_v1 = vadd.f32 %v693_v52, %v168_v59 }
 0x145   :  { %v696_v5 = vadd.f32 %v695_v53, %v172_v60 }
 0x17c   :  { %v775_v0 = vpop.f32.mrb[0].mxu0 }
 0x17d   :  { %v956_v2 = vadd.f32 %v775_v0, %v690_v61  ;;  %v777_v3 = vpop.f32.mrb[1].mxu0 }
 0x17e   :  { %v958_v6 = vadd.f32 %v777_v3, %v692_v62  ;;  %v779_v7 = vpop.f32.mrb[2].mxu0 }
 0x17f   :  { %v784_v9 = vmax.f32 %v956_v2, 0.0  ;;  %v960_v10 = vadd.f32 %v779_v7, %v694_v1  ;;  %v781_v11 = vpop.f32.mrb[3].mxu0 }
 0x180   :  { %v785_v12 = vmax.f32 %v958_v6, 0.0  ;;  %v962_v13 = vadd.f32 %v781_v11, %v696_v5 }
 0x181   :  { %v786_v14 = vmax.f32 %v960_v10, 0.0  ;;  %v800_v15 = vmul.f32 %v793_v4, %v784_v9 }
 0x182   :  { %v787_v16 = vmax.f32 %v962_v13, 0.0  ;;  %v801_v17 = vmul.f32 %v797_v8, %v785_v12 }
 0x183   :  { %v802_v18 = vmul.f32 %v793_v4, %v786_v14 }
 0x184   :  { %v803_v19 = vmul.f32 %v797_v8, %v787_v16  ;;  %v804_v20 = vadd.f32 %v801_v17, %v800_v15 }
 0x186   :  { %805 = vadd.xlane.f32.xlu0 %v804_v20  ;;  %v807_v21 = vadd.f32 %v803_v19, %v802_v18 }
 0x18a   :  { %808 = vadd.xlane.f32.xlu0 %v807_v21 }
 0x213   :  { %v806_v23 = vpop.xlane.xlu0 %805 }
 0x214   :  { %v812_v24 = vadd.f32 %v811_v22, %v806_v23 }
 0x216   :  { %815 = vst.msk [vmem:[#allocation7] sm:$0xff] %vm814_vm0, %v812_v24 }
 0x217   :  { %v809_v25 = vpop.xlane.xlu0 %808 }
 0x21d   :  { %v846_v26 = vld [vmem:[#allocation7] sm:$0xff] }
 0x21e   :  { %847 = vst [vmem:[%s1242_s5] sm:$0xff] %v846_v26 }
 0x21f   :  { %853 = vsyncpa [#allocation4], 1 }
 0x220   :  { %854 = vsyncpa [#allocation6], 1 }

</bundles_post_ra>
